<compile_context>
chip_gen: v6e
topology: v6e:2x2x1
jax: 0.10.0
libtpu: 0.0.40
codegen_flags: <defaults>
</compile_context>

<pallas_src>
import functools

import jax
import jax.numpy as jnp
from jax import lax
from jax.experimental import pallas as pl
from jax.experimental.pallas import tpu as pltpu


def _contrast_kernel(xi_ref, xj_ref, out_ref, z_ref, *, batch_size, row_block,
                     temperature):
    B = batch_size
    N = 2 * B
    TB = row_block
    r = pl.program_id(0)
    inv_t = jnp.float32(1.0 / temperature)
    eps = jnp.float32(1e-12)  # F.normalize default eps

    # ---- step 0: normalize both views into persistent scratch, zero the acc ----
    @pl.when(r == 0)
    def _():
        xi = xi_ref[...].astype(jnp.float32)
        xj = xj_ref[...].astype(jnp.float32)
        # rsqrt + multiply instead of sqrt + divide; clamping norm^2 with eps^2
        # preserves F.normalize's max(norm, eps) semantics.
        ssi = jnp.sum(xi * xi, axis=1, keepdims=True)
        ssj = jnp.sum(xj * xj, axis=1, keepdims=True)
        z_ref[0:B, :] = xi * lax.rsqrt(jnp.maximum(ssi, eps * eps))
        z_ref[B:N, :] = xj * lax.rsqrt(jnp.maximum(ssj, eps * eps))
        out_ref[...] = jnp.zeros_like(out_ref)

    # ---- similarity tile: rows [r*TB, r*TB+TB) of z against all of z ----------
    row0 = pl.multiple_of(r * TB, TB)
    z_blk = z_ref[pl.ds(row0, TB), :]            # [TB, D]
    z_all = z_ref[...]                           # [N, D]
    # contract feature dims directly -> no explicit transpose of z
    sim = lax.dot_general(z_blk, z_all, (((1,), (1,)), ((), ())),
                          preferred_element_type=jnp.float32)      # [TB, N]

    grow = row0 + lax.broadcasted_iota(jnp.int32, (TB, N), 0)      # global row id
    col = lax.broadcasted_iota(jnp.int32, (TB, N), 1)
    partner = jnp.where(grow < B, grow + B, grow - B)              # positive column

    # positives come straight off the MXU tile (same values the reference reads
    # from diag(sim, +/-B)); denominator drops only the self column.
    # NOTE: sim in [-1, 1] after normalization, so exp(sim/t) is safe in f32 for
    # any temperature >~ 0.011.
    pos = jnp.sum(jnp.where(col == partner, sim, 0.0), axis=1, keepdims=True)   # [TB,1]
    exp_sim = jnp.exp(sim * inv_t)                                              # EUP
    denom = jnp.sum(jnp.where(col == grow, 0.0, exp_sim), axis=1, keepdims=True)  # [TB,1]

    per_row = -pos * inv_t + jnp.log(denom)                                     # [TB,1]
    out_ref[...] = out_ref[...] + jnp.sum(per_row, axis=0, keepdims=True)

    # ---- last step: mean over the 2B rows -------------------------------------
    @pl.when(r == pl.num_programs(0) - 1)
    def _():
        out_ref[...] = out_ref[...] * jnp.float32(1.0 / N)


def contrast_loss(x_i, x_j, temperature=0.5, row_block=None):
    B, D = x_i.shape
    N = 2 * B
    if row_block is None:
        row_block = min(N, 128)   # lane/MXU-friendly default; use 256 on v6e/v7x
    assert N % row_block == 0, "row_block must divide 2*batch_size"
    n_blocks = N // row_block

    kernel = functools.partial(
        _contrast_kernel, batch_size=B, row_block=row_block,
        temperature=float(temperature),
    )

    # VMEM budget: inputs + normalized-z scratch + a few [TB, N] f32 temporaries,
    # with headroom; clamped so the request is valid on v5e/v6e/v7x.
    vmem_bytes = 4 * (3 * N * D + 8 * row_block * max(N, 128)) + (1 << 20)
    vmem_bytes = int(min(max(vmem_bytes, 4 << 20), 32 << 20))

    out = pl.pallas_call(
        kernel,
        out_shape=jax.ShapeDtypeStruct((1, 1), jnp.float32),
        grid=(n_blocks,),
        in_specs=[
            pl.BlockSpec(memory_space=pltpu.MemorySpace.VMEM),   # x_i, whole array
            pl.BlockSpec(memory_space=pltpu.MemorySpace.VMEM),   # x_j, whole array
        ],
        out_specs=pl.BlockSpec((1, 1), lambda r: (0, 0)),        # resident accumulator
        scratch_shapes=[pltpu.VMEM((N, D), jnp.float32)],        # normalized z
        compiler_params=pltpu.CompilerParams(
            # scalar accumulation across row blocks -> reduction axis.
            # (A megacore-parallel variant would emit per-block partials instead.)
            dimension_semantics=("arbitrary",),
            vmem_limit_bytes=vmem_bytes,
        ),
    )(x_i, x_j)
    return out[0, 0]


def contrast_loss_ref(x_i, x_j, temperature=0.5):
    # pure-JAX reference mirroring the PyTorch module
    B = x_i.shape[0]
    zi = x_i / jnp.maximum(jnp.linalg.norm(x_i, axis=1, keepdims=True), 1e-12)
    zj = x_j / jnp.maximum(jnp.linalg.norm(x_j, axis=1, keepdims=True), 1e-12)
    z = jnp.concatenate([zi, zj], axis=0)
    sim = z @ z.T
    sim_ij = jnp.diagonal(sim, offset=B)
    sim_ji = jnp.diagonal(sim, offset=-B)
    pos = jnp.concatenate([sim_ij, sim_ji], axis=0)
    nom = jnp.exp(pos / temperature)
    neg_mask = 1.0 - jnp.eye(2 * B, dtype=jnp.float32)
    denom = jnp.sum(neg_mask * jnp.exp(sim / temperature), axis=1)
    return jnp.sum(-jnp.log(nom / denom)) / (2 * B)


if __name__ == "__main__":
    B, D = 8, 128  # batch_size per view, feature dim
    key = jax.random.PRNGKey(0)
    k1, k2 = jax.random.split(key)
    x_i = jax.random.normal(k1, (B, D), dtype=jnp.float32)
    x_j = jax.random.normal(k2, (B, D), dtype=jnp.float32)

    # row_block=8 -> 2 grid steps, exercising the accumulator across the grid.
    loss = jax.block_until_ready(contrast_loss(x_i, x_j, temperature=0.5, row_block=8))
    loss_ref = jax.block_until_ready(contrast_loss_ref(x_i, x_j, temperature=0.5))
    assert jnp.allclose(loss, loss_ref, rtol=1e-4, atol=1e-5), (loss, loss_ref)
    print("KERNEL_OK")
</pallas_src>

<mosaic_0001>
module attributes {stable_mosaic.version = 11 : i64} {
  func.func @_contrast_kernel(%arg0: i32, %arg1: memref<8x128xf32, #tpu.memory_space<vmem>>, %arg2: memref<8x128xf32, #tpu.memory_space<vmem>>, %arg3: memref<1x1xf32, #tpu.memory_space<vmem>>, %arg4: memref<16x128xf32, #tpu.memory_space<vmem>>) attributes {dimension_semantics = [#tpu.dimension_semantics<arbitrary>], iteration_bounds = array<i64: 2>, scalar_prefetch = 0 : i64, scratch_operands = 1 : i64, tpu.core_type = #tpu.core_type<tc>, window_params = [{pipeline_mode = #tpu.pipeline_mode<synchronous>, transform_indices = @transform_0, window_bounds = array<i64: 8, 128>}, {pipeline_mode = #tpu.pipeline_mode<synchronous>, transform_indices = @transform_1, window_bounds = array<i64: 8, 128>}, {pipeline_mode = #tpu.pipeline_mode<synchronous>, transform_indices = @transform_2, window_bounds = array<i64: 1, 1>}]} {
    %c0_i32 = arith.constant 0 : i32
    %0 = arith.cmpi eq, %arg0, %c0_i32 : i32
    %1 = arith.extui %0 : i1 to i32
    %cst = arith.constant 9.99999996E-13 : f32
    %c0_i32_0 = arith.constant 0 : i32
    %2 = arith.cmpi ne, %1, %c0_i32_0 : i32
    scf.if %2 {
      %c0_20 = arith.constant 0 : index
      %c0_21 = arith.constant 0 : index
      %47 = vector.load %arg1[%c0_20, %c0_21] : memref<8x128xf32, #tpu.memory_space<vmem>>, vector<8x128xf32>
      %c0_22 = arith.constant 0 : index
      %c0_23 = arith.constant 0 : index
      %48 = vector.load %arg2[%c0_22, %c0_23] : memref<8x128xf32, #tpu.memory_space<vmem>>, vector<8x128xf32>
      %49 = arith.mulf %47, %47 : vector<8x128xf32>
      %cst_24 = arith.constant dense<0.000000e+00> : vector<8xf32>
      %50 = vector.multi_reduction <add>, %49, %cst_24 [1] : vector<8x128xf32> to vector<8xf32>
      %51 = vector.shape_cast %50 : vector<8xf32> to vector<8x1xf32>
      %52 = arith.mulf %48, %48 : vector<8x128xf32>
      %cst_25 = arith.constant dense<0.000000e+00> : vector<8xf32>
      %53 = vector.multi_reduction <add>, %52, %cst_25 [1] : vector<8x128xf32> to vector<8xf32>
      %54 = vector.shape_cast %53 : vector<8xf32> to vector<8x1xf32>
      %55 = arith.mulf %cst, %cst : f32
      %56 = vector.broadcast %55 : f32 to vector<8x1xf32>
      %57 = arith.maximumf %51, %56 : vector<8x1xf32>
      %58 = math.rsqrt %57 : vector<8x1xf32>
      %59 = vector.broadcast %58 : vector<8x1xf32> to vector<8x128xf32>
      %60 = arith.mulf %47, %59 : vector<8x128xf32>
      %c0_26 = arith.constant 0 : index
      %c0_27 = arith.constant 0 : index
      %61 = vector.load %arg4[%c0_26, %c0_27] : memref<16x128xf32, #tpu.memory_space<vmem>>, vector<8x128xf32>
      tpu.vector_store %arg4[%c0_26, %c0_27], %60 {strides = array<i32>} : memref<16x128xf32, #tpu.memory_space<vmem>>, vector<8x128xf32>,
      %62 = arith.mulf %cst, %cst : f32
      %63 = vector.broadcast %62 : f32 to vector<8x1xf32>
      %64 = arith.maximumf %54, %63 : vector<8x1xf32>
      %65 = math.rsqrt %64 : vector<8x1xf32>
      %66 = vector.broadcast %65 : vector<8x1xf32> to vector<8x128xf32>
      %67 = arith.mulf %48, %66 : vector<8x128xf32>
      %c8 = arith.constant 8 : index
      %c0_28 = arith.constant 0 : index
      %68 = vector.load %arg4[%c8, %c0_28] : memref<16x128xf32, #tpu.memory_space<vmem>>, vector<8x128xf32>
      tpu.vector_store %arg4[%c8, %c0_28], %67 {strides = array<i32>} : memref<16x128xf32, #tpu.memory_space<vmem>>, vector<8x128xf32>,
      %cst_29 = arith.constant 0.000000e+00 : f32
      %69 = vector.broadcast %cst_29 : f32 to vector<1x1xf32>
      %c0_30 = arith.constant 0 : index
      %c0_31 = arith.constant 0 : index
      %70 = vector.load %arg3[%c0_30, %c0_31] : memref<1x1xf32, #tpu.memory_space<vmem>>, vector<1x1xf32>
      tpu.vector_store %arg3[%c0_30, %c0_31], %69 {strides = array<i32>} : memref<1x1xf32, #tpu.memory_space<vmem>>, vector<1x1xf32>,
    } else {
    }
    %c8_i32 = arith.constant 8 : i32
    %3 = arith.muli %arg0, %c8_i32 : i32
    %4 = tpu.assume_multiple %3, 8 : i32
    %5 = arith.index_cast %4 : i32 to index
    %c0 = arith.constant 0 : index
    %6 = vector.load %arg4[%5, %c0] : memref<16x128xf32, #tpu.memory_space<vmem>>, vector<8x128xf32>
    %c0_1 = arith.constant 0 : index
    %c0_2 = arith.constant 0 : index
    %7 = vector.load %arg4[%c0_1, %c0_2] : memref<16x128xf32, #tpu.memory_space<vmem>>, vector<16x128xf32>
    %cst_3 = arith.constant dense<0.000000e+00> : vector<8x16xf32>
    %8 = tpu.matmul %6, %7, %cst_3 {dimension_numbers = #tpu.dot_dimension_numbers<[1], [1], [0], [0], [0, 0, 1, 0], [], []>} : vector<8x128xf32>, vector<16x128xf32>, vector<8x16xf32> -> vector<8x16xf32>
    %9 = tpu.iota {dimensions = array<i32: 0>} : vector<8x16xi32>
    %10 = vector.broadcast %4 : i32 to vector<8x16xi32>
    %11 = arith.addi %10, %9 : vector<8x16xi32>
    %12 = tpu.iota {dimensions = array<i32: 1>} : vector<8x16xi32>
    %c8_i32_4 = arith.constant 8 : i32
    %13 = vector.broadcast %c8_i32_4 : i32 to vector<8x16xi32>
    %14 = arith.cmpi slt, %11, %13 : vector<8x16xi32>
    %c8_i32_5 = arith.constant 8 : i32
    %15 = vector.broadcast %c8_i32_5 : i32 to vector<8x16xi32>
    %16 = arith.addi %11, %15 : vector<8x16xi32>
    %c8_i32_6 = arith.constant 8 : i32
    %17 = vector.broadcast %c8_i32_6 : i32 to vector<8x16xi32>
    %18 = arith.subi %11, %17 : vector<8x16xi32>
    %19 = arith.select %14, %16, %18 : vector<8x16xi1>, vector<8x16xi32>
    %20 = arith.cmpi eq, %12, %19 : vector<8x16xi32>
    %cst_7 = arith.constant 0.000000e+00 : f32
    %21 = vector.broadcast %cst_7 : f32 to vector<8x16xf32>
    %22 = arith.select %20, %8, %21 : vector<8x16xi1>, vector<8x16xf32>
    %cst_8 = arith.constant dense<0.000000e+00> : vector<8xf32>
    %23 = vector.multi_reduction <add>, %22, %cst_8 [1] : vector<8x16xf32> to vector<8xf32>
    %24 = vector.shape_cast %23 : vector<8xf32> to vector<8x1xf32>
    %cst_9 = arith.constant 2.000000e+00 : f32
    %25 = vector.broadcast %cst_9 : f32 to vector<8x16xf32>
    %26 = arith.mulf %8, %25 : vector<8x16xf32>
    %27 = math.exp %26 : vector<8x16xf32>
    %28 = arith.cmpi eq, %12, %11 : vector<8x16xi32>
    %cst_10 = arith.constant 0.000000e+00 : f32
    %29 = vector.broadcast %cst_10 : f32 to vector<8x16xf32>
    %30 = arith.select %28, %29, %27 : vector<8x16xi1>, vector<8x16xf32>
    %cst_11 = arith.constant dense<0.000000e+00> : vector<8xf32>
    %31 = vector.multi_reduction <add>, %30, %cst_11 [1] : vector<8x16xf32> to vector<8xf32>
    %32 = vector.shape_cast %31 : vector<8xf32> to vector<8x1xf32>
    %cst_12 = arith.constant 0.000000e+00 : f32
    %33 = vector.broadcast %cst_12 : f32 to vector<8x1xf32>
    %34 = arith.subf %33, %24 : vector<8x1xf32>
    %cst_13 = arith.constant 2.000000e+00 : f32
    %35 = vector.broadcast %cst_13 : f32 to vector<8x1xf32>
    %36 = arith.mulf %34, %35 : vector<8x1xf32>
    %37 = math.log %32 : vector<8x1xf32>
    %38 = arith.addf %36, %37 : vector<8x1xf32>
    %c0_14 = arith.constant 0 : index
    %c0_15 = arith.constant 0 : index
    %39 = vector.load %arg3[%c0_14, %c0_15] : memref<1x1xf32, #tpu.memory_space<vmem>>, vector<1x1xf32>
    %cst_16 = arith.constant dense<0.000000e+00> : vector<1xf32>
    %40 = vector.multi_reduction <add>, %38, %cst_16 [0] : vector<8x1xf32> to vector<1xf32>
    %41 = vector.shape_cast %40 : vector<1xf32> to vector<1x1xf32>
    %42 = arith.addf %39, %41 : vector<1x1xf32>
    %c0_17 = arith.constant 0 : index
    %c0_18 = arith.constant 0 : index
    %43 = vector.load %arg3[%c0_17, %c0_18] : memref<1x1xf32, #tpu.memory_space<vmem>>, vector<1x1xf32>
    tpu.vector_store %arg3[%c0_17, %c0_18], %42 {strides = array<i32>} : memref<1x1xf32, #tpu.memory_space<vmem>>, vector<1x1xf32>,
    %c1_i32 = arith.constant 1 : i32
    %44 = arith.cmpi eq, %arg0, %c1_i32 : i32
    %45 = arith.extui %44 : i1 to i32
    %c0_i32_19 = arith.constant 0 : i32
    %46 = arith.cmpi ne, %45, %c0_i32_19 : i32
    scf.if %46 {
      %c0_20 = arith.constant 0 : index
      %c0_21 = arith.constant 0 : index
      %47 = vector.load %arg3[%c0_20, %c0_21] : memref<1x1xf32, #tpu.memory_space<vmem>>, vector<1x1xf32>
      %cst_22 = arith.constant 6.250000e-02 : f32
      %48 = vector.broadcast %cst_22 : f32 to vector<1x1xf32>
      %49 = arith.mulf %47, %48 : vector<1x1xf32>
      %c0_23 = arith.constant 0 : index
      %c0_24 = arith.constant 0 : index
      %50 = vector.load %arg3[%c0_23, %c0_24] : memref<1x1xf32, #tpu.memory_space<vmem>>, vector<1x1xf32>
      tpu.vector_store %arg3[%c0_23, %c0_24], %49 {strides = array<i32>} : memref<1x1xf32, #tpu.memory_space<vmem>>, vector<1x1xf32>,
    } else {
    }
    return
  }
  func.func @transform_0(%arg0: i32) -> (i32, i32) {
    %c0_i32 = arith.constant 0 : i32
    %c0_i32_0 = arith.constant 0 : i32
    %c0_i32_1 = arith.constant 0 : i32
    return %c0_i32, %c0_i32_0 : i32, i32
  }
  func.func @transform_1(%arg0: i32) -> (i32, i32) {
    %c0_i32 = arith.constant 0 : i32
    %c0_i32_0 = arith.constant 0 : i32
    %c0_i32_1 = arith.constant 0 : i32
    return %c0_i32, %c0_i32_0 : i32, i32
  }
  func.func @transform_2(%arg0: i32) -> (i32, i32) {
    %c0_i32 = arith.constant 0 : i32
    %c0_i32_0 = arith.constant 0 : i32
    %c0_i32_1 = arith.constant 0 : i32
    return %c0_i32, %c0_i32_0 : i32, i32
  }
}

</mosaic_0001>

<bundles_post_ra>
// kernel: tpu_custom_call.1
= control target key start
LH: loop header
LB: loop body
LE: loop exit
PB: predicated region body
PF: predicated region fallthrough
CT: control target
= control target key end

     0   :  { %7 = vsyncpa [#allocation4], 0  ;;  %s597_s0 = inlined_call_operand.hbm [shape: f32[8,128], index: 0, kind: input, shape index: {}]   ;;  %s598_s1 = inlined_call_operand.hbm [shape: f32[8,128], index: 1, kind: input, shape index: {}]   ;;  %s599_s2 = inlined_call_operand.hbm [shape: f32[1,1], index: 2, kind: output, shape index: {}]  }
   0x1   :  { %8 = vsyncpa [#allocation7], 0 }
   0x2   :  { %9 = vsyncpa [#allocation5], 0  ;;  %s526_s9 = smov 0  }
   0x3 LB: > { %s532_s10 = sadd.s32 4294967295, %s503_s9   ;;  %p338_p0 = scmp.ge.s32.totalorder %s503_s9, 1  ;;  %s503_s9 = sphi %s526_s9, %s15_s9  }
   0x4   : > { %p83_p1 = scmp.lt.s32.totalorder %s503_s9, 3  ;;  %p600_p3 = scmp.eq.s32.totalorder %s532_s10, 0 }
   0x5   : > { %s505_s12 = smov [#allocation3]   ;;  %s506_s14 = smov [#allocation6]  }
   0x6   : > { %p538_p4 = pnand %p338_p0, %p83_p1  ;;  %s96_s13 = sshll.u32 %s505_s12, 4  ;;  %s97_s13 = int_to_ptr.vmem [resolvable:$true] %s96_s13 }
   0x7   : > { %s107_s15 = sshll.u32 %s506_s14, 4  ;;  %s420_s17 = scalar_lea.vmem %s97_s13, 128  ;;  %s108_s15 = int_to_ptr.vmem [resolvable:$true] %s107_s15 }
   0x8   : > { %s602_s11 = scalar_select %p538_p4, 1, 0 }
   0x9   : > { %p374_p5 = pneg %p538_p4  ;;  %p421_p8 = scmp.ne.s32.totalorder %s97_s13, %s420_s17 }
   0xa   : > { %p428_p11 = scmp.lt.s32.totalorder %s97_s13, %s97_s13  ;;  %p429_p12 = scmp.lt.s32.totalorder %s420_s17, %s420_s17 }
   0xb   : > { %p546_p6 = pnand %p600_p3, %p374_p5 }
   0xc   : > { %p430_p13 = por %p429_p12, %p428_p11 }
   0xd   : > { %p411_p7 = pneg %p546_p6 }
   0xf   : > { %p423_p9 = pnand %p421_p8, %p411_p7 }
  0x11   : > { %p424_p10 = pneg %p423_p9 }
  0x13   : > { %p431_p0 = pnand %p430_p13, %p424_p10 }
  0x15   : > { %434 = shalt.err (!%p431_p0)
}
  0x16   : > { %377 = dma.hbm_to_vmem [thread:$0]  (!%p546_p6), %s597_s0, 128, %s97_s13, [#allocation4]  }
  0x17   : > { %s446_s20 = scalar_lea.vmem %s108_s15, 128  ;;  %p454_p8 = scmp.lt.s32.totalorder %s108_s15, %s108_s15 }
  0x18   : > { %p447_p1 = scmp.ne.s32.totalorder %s108_s15, %s446_s20  ;;  %p455_p9 = scmp.lt.s32.totalorder %s446_s20, %s446_s20 }
  0x1a   : > { %p449_p5 = pnand %p447_p1, %p411_p7  ;;  %p456_p3 = por %p455_p9, %p454_p8 }
  0x1c   : > { %p450_p2 = pneg %p449_p5 }
  0x1e   : > { %p457_p4 = pnand %p456_p3, %p450_p2 }
  0x20   : > { %460 = shalt.err (!%p457_p4)
}
  0x21   : > { %380 = dma.hbm_to_vmem [thread:$0]  (!%p546_p6), %s598_s1, 128, %s108_s15, [#allocation7]  }
  0x22   : > { %p604_p10 = scmp.ne.s32.totalorder %s602_s11, 0 }
  0x23   : > { %p605_p11 = scmp.eq.s32.totalorder (!%p604_p10), %s532_s10, 0 }
  0x24   : > { %120 = sbr.rel (%p604_p10) target bundleno = 640 (0x280), region = 28 }
  0x29   : > { %490 = dma.done.wait (%p605_p11), [#allocation4], 128   ;;  %p606_p7 = pmov %p605_p11 }
  0x2b   : > { %492 = vsyncadd (%p606_p7), [#allocation4], 4294967168  ;;  %p607_p12 = pmov %p606_p7 }
  0x2c   : > { %p608_p2 = pmov %p606_p7 }
  0x2d   : > { %494 = dma.done.wait (%p607_p12), [#allocation7], 128  }
  0x2e   : > { %496 = vsyncadd (%p608_p2), [#allocation7], 4294967168  ;;  %p609_p3 = scmp.ne.s32.totalorder %s532_s10, 0 }
  0x30   : > { %139 = sbr.rel (%p609_p3) target bundleno = 217 (0xd9), region = 40 }
  0x35   : > { %v140_v0 = vld [vmem:[#allocation3] sm:$0xff]  ;;  %v141_v1 = vld [vmem:[#allocation6] sm:$0xff]  ;;  %vm156_vm0 = vcmask 0   ;;  %v507_v4 = vmov 0.0  }
  0x36   : > { %v142_v2 = vmul.f32 %v140_v0, %v140_v0  ;;  %v145_v3 = vmul.f32 %v141_v1, %v141_v1  ;;  %157 = vst.msk [vmem:[#allocation8] sm:$0x1] %vm156_vm0, %v507_v4 }
  0x38   : > { %143 = vadd.xlane.f32.xlu0 %v142_v2 }
  0x3c   : > { %146 = vadd.xlane.f32.xlu0 %v145_v3 }
  0xc1   : > { %v144_v5 = vpop.xlane.xlu0 %143 }
  0xc2   : > { %v148_v6 = vmax.f32 %v144_v5, 1e-24 }
  0xc4   : > { %401 = vrsqrt.f32 %v148_v6 }
  0xc5   : > { %v147_v7 = vpop.xlane.xlu0 %146 }
  0xc6   : > { %v152_v8 = vmax.f32 %v147_v7, 1e-24 }
  0xc8   : > { %403 = vrsqrt.f32 %v152_v8 }
  0xd1   : > { %v402_v9 = vpop.eup %401 }
  0xd2   : > { %v150_v10 = vmul.f32 %v402_v9, %v140_v0 }
  0xd4   : > { %151 = vst [vmem:[#allocation2] sm:$0xff] %v150_v10 }
  0xd5   : > { %v404_v11 = vpop.eup %403 }
  0xd6   : > { %v154_v12 = vmul.f32 %v404_v11, %v141_v1 }
  0xd8   : > { %155 = vst [vmem:[#allocation2 + $0x8] sm:$0xff] %v154_v12 }
  0xd9 PF: > { %s345_s23 = sshll.u32 %s532_s10, 3  ;;  %v508_v14 = vmov 0.0   ;;  %vm509_vm1 = vmmov 0   ;;  %v233_v17 = vlaneseq  ;;  %vm245_vm5 = vcmask 130048   ;;  %v262_v46 = vld [vmem:[#allocation8] sm:$0x1] }
  0xda   : > { %355 = vmatprep.subr.mxu0 %v508_v14  ;;  %359 = vmatprep.mubr.msk.f32.mxu0 %vm509_vm1, %v508_v14  ;;  %s159_s24 = scalar_lea.vmem [#allocation2], %s345_s23  ;;  %v235_v23 = vstv %s345_s23  ;;  %vm270_vm6 = vcmask 0   ;;  %p347_p4 = scmp.ne.s32.totalorder %s532_s10, 1 }
  0xdb   : > { %v161_v15 = vld [vmem:[#allocation2] sm:$0xff]  ;;  %v234_v21 = vshrl.u32 %v233_v17, 7  ;;  %v238_v27 = vand.u32 127, %v233_v17 }
  0xdd   : > { %v236_v24 = vadd.s32 %v235_v23, %v234_v21 }
  0xdf   : > { %v162_v13 = vld [vmem:[#allocation2 + $0x8] sm:$0xff]  ;;  %v160_v16 = vld [vmem:[%s159_s24] sm:$0xff]  ;;  %v240_v25 = vadd.s32 8, %v236_v24  ;;  %v346_v26 = vadd.s32 4294967288, %v236_v24  ;;  %vm239_vm2 = vcmp.lt.s32.totalorder %v236_v24, 8  ;;  %vm252_vm3 = vcmp.eq.s32.totalorder %v238_v27, %v236_v24 }
  0xe0   : > { %356 = vmatpush3.xpose.msra.mxu0 %v162_v13 }
  0xe1   : > { %357 = vmatprep.subr.mxu0 %v508_v14  ;;  %v242_v28 = vsel %vm239_vm2, %v240_v25, %v346_v26 }
  0xe2   : > { %vm243_vm4 = vcmp.eq.s32.totalorder %v238_v27, %v242_v28 }
  0xe4   : > { %358 = vmatpush3.xpose.msra.mxu0 %v161_v15 }
  0xe7   : > { %360 = vmatmul.mubr.f32.vlgmr.msra.gmra.mxu0 %v160_v16 }
 0x1a7   : > { %v229_v18 = vpop.f32.mrf.mxu0 }
 0x1a8   : > { %v249_v19 = vmul.f32 2.0, %v229_v18  ;;  %v244_v32 = vsel %vm243_vm4, %v229_v18, 0.0 }
 0x1a9   : > { %v361_v20 = vpop.f32.mrf.mxu0  ;;  %v246_v33 = vsel %vm245_vm5, %v244_v32, 0.0 }
 0x1aa   : > { %v250_v22 = vmul.f32 1.442695, %v249_v19 }
 0x1ac   : > { %405 = vpow2.f32 %v250_v22 }
 0x1b9   : > { %v406_v29 = vpop.eup %405 }
 0x1ba   : > { %v253_v30 = vsel %vm252_vm3, 0.0, %v406_v29 }
 0x1bb   : > { %v254_v31 = vsel %vm245_vm5, %v253_v30, 0.0 }
 0x1bc   : > { %255 = vadd.xlane.f32.xlu0 %v254_v31 }
 0x1c0   : > { %247 = vadd.xlane.f32.xlu0 %v246_v33 }
 0x245   : > { %v256_v34 = vpop.xlane.xlu0 %255 }
 0x246   : > { %407 = vlog2.f32 %v256_v34 }
 0x249   : > { %v248_v35 = vpop.xlane.xlu0 %247 }
 0x24a   : > { %v257_v36 = vsub.f32 0.0, %v248_v35 }
 0x24c   : > { %v258_v39 = vmul.f32 2.0, %v257_v36 }
 0x253   : > { %v408_v37 = vpop.eup %407 }
 0x254   : > { %v260_v38 = vmul.f32 0.6931472, %v408_v37 }
 0x256   : > { %v261_v40 = vadd.f32 %v260_v38, %v258_v39 }
 0x258   : > { %v263_v41 = vrot.slane %v261_v40, 4 }
 0x25a   : > { %v264_v42 = vadd.f32 %v263_v41, %v261_v40 }
 0x25c   : > { %v265_v43 = vrot.slane %v264_v42, 2 }
 0x25e   : > { %v266_v44 = vadd.f32 %v265_v43, %v264_v42 }
 0x260   : > { %v267_v45 = vrot.slane %v266_v44, 1 }
 0x262   : > { %v268_v47 = vadd.f32 %v267_v45, %v266_v44  ;;  %275 = sbr.rel (%p347_p4) target bundleno = 625 (0x271), region = 44 }
 0x264   : > { %v269_v48 = vadd.f32 %v268_v47, %v262_v46 }
 0x266   : > { %271 = vst.msk [vmem:[#allocation8] sm:$0x1] %vm270_vm6, %v269_v48 }
 0x26d   : > { %v276_v49 = vld [vmem:[#allocation8] sm:$0x1] }
 0x26e   : > { %v277_v50 = vmul.f32 0.0625, %v276_v49 }
 0x270   : > { %278 = vst.msk [vmem:[#allocation8] sm:$0x1] %vm270_vm6, %v277_v50 }
 0x271 PF: > { %p385_p6 = scmp.eq.s32.totalorder %s532_s10, 1  ;;  %s510_s25 = smov [#allocation8]  }
 0x272   : > { %s286_s26 = sshll.u32 %s510_s25, 4  ;;  %s287_s26 = int_to_ptr.vmem [resolvable:$true] %s286_s26 }
 0x273   : > { %s461_s27 = scalar_lea.vmem %s287_s26, 16  ;;  %s467_s28 = scalar_lea.vmem %s287_s26, 32 }
 0x274   : > { %p462_p13 = scmp.ne.s32.totalorder %s287_s26, %s461_s27  ;;  %p468_p5 = scmp.lt.s32.totalorder %s287_s26, %s287_s26 }
 0x275   : > { %p469_p8 = scmp.lt.s32.totalorder %s467_s28, %s461_s27 }
 0x276   : > { %p463_p0 = pnand %p462_p13, %p385_p6 }
 0x277   : > { %p470_p9 = por %p469_p8, %p468_p5 }
 0x278   : > { %p464_p1 = pneg %p463_p0 }
 0x27a   : > { %p471_p10 = pnand %p470_p9, %p464_p1 }
 0x27c   : > { %474 = shalt.err (!%p471_p10)
}
 0x27d   : > { %371 = dma.vmem_to_hbm [thread:$0]  (%p385_p6), %s287_s26, 16, %s599_s2, [#allocation5]  }
 0x27e   : > { %498 = dma.done.wait (%p385_p6), [#allocation5], 16  }
 0x27f   : > { %500 = vsyncadd (%p385_p6), [#allocation5], 4294967280 }
 0x280 PF: > { %s15_s9 = sadd.s32 1, %s503_s9  }
 0x281   : > { %p12_p11 = scmp.ge.s32.totalorder %s15_s9, 4  }
 0x283   :  { %14 = sbr.rel (!%p12_p11) target bundleno = 3 (0x3), region = 70 }
 0x288   :  { %299 = vsyncpa [#allocation4], 1 }
 0x289   :  { %301 = vsyncpa [#allocation4 + $0x1], 1 }
 0x28a   :  { %302 = vsyncpa [#allocation7], 1 }
 0x28b   :  { %303 = vsyncpa [#allocation5], 1 }
 0x28c   :  { %305 = vsyncpa [#allocation5 + $0x1], 1 }

</bundles_post_ra>
